<compile_context>
chip_gen: v6e
topology: v6e:2x2x1
jax: 0.10.0
libtpu: 0.0.40
codegen_flags: <defaults>
</compile_context>

<pallas_src>
import functools

import jax
import jax.numpy as jnp
from jax.experimental import pallas as pl
from jax.experimental.pallas import tpu as pltpu


def _ce_partial_kernel(logits_ref, target_ref, psum_ref, *, n_valid):
    """Partial sum of per-row cross-entropy NLL for one batch tile."""
    tile_n = logits_ref.shape[0]
    logits = logits_ref[...].astype(jnp.float32)             # (tile_n, C) f32 math
    tgt = target_ref[...]                                     # (tile_n, 1) int32

    # numerically stable logsumexp over the class (lane) axis
    m = jnp.max(logits, axis=-1, keepdims=True)
    lse = jnp.log(jnp.sum(jnp.exp(logits - m), axis=-1, keepdims=True)) + m

    # gather target-class logit via one-hot compare (no dynamic gather on TPU)
    cls_ids = jax.lax.broadcasted_iota(jnp.int32, logits.shape, 1)
    picked = jnp.sum(jnp.where(cls_ids == tgt, logits, 0.0),
                     axis=-1, keepdims=True)

    nll = lse - picked                                        # (tile_n, 1)

    # mask rows beyond the true batch size (padded last tile); where() also
    # blocks NaN/Inf from uninitialised padded rows.
    row = (jax.lax.broadcasted_iota(jnp.int32, (tile_n, 1), 0)
           + pl.program_id(0) * tile_n)
    partial = jnp.sum(jnp.where(row < n_valid, nll, 0.0))

    # lane-dense full-block (unmasked vst) store of the per-tile partial sum
    psum_ref[...] = jnp.full(psum_ref.shape, partial, dtype=jnp.float32)


def _round_up(x, m):
    return ((x + m - 1) // m) * m


def _choose_tile_n(n, c, itemsize):
    # keep a single logits tile <= ~8 MiB so 2x (double buffer) plus the padded
    # target tile and output block stay well under the 32 MiB scoped-VMEM limit
    # requested below (safe for v5e / v6e / v7x).
    budget_bytes = 8 * 1024 * 1024
    t = max(8, min(512, budget_bytes // max(1, c * itemsize)))
    t = max(8, (t // 8) * 8)
    t = min(t, _round_up(n, 8))
    return max(t, 8)


def elbo_forward(logits, target, kl, beta, train_size, *, tile_n=None):
    """logits: (N, C) float (f32 or bf16), target: (N,) int class ids -> f32 scalar."""
    N, C = logits.shape
    tgt = target.astype(jnp.int32).reshape(N, 1)

    if tile_n is None:
        tile_n = _choose_tile_n(N, C, jnp.dtype(logits.dtype).itemsize)
    tile_n = max(8, (int(tile_n) // 8) * 8)
    num_tiles = pl.cdiv(N, tile_n)

    partials = pl.pallas_call(
        functools.partial(_ce_partial_kernel, n_valid=N),
        out_shape=jax.ShapeDtypeStruct((num_tiles, 8, 128), jnp.float32),
        grid=(num_tiles,),
        in_specs=[
            pl.BlockSpec((tile_n, C), lambda i: (i, 0)),   # logits tile (native dtype)
            pl.BlockSpec((tile_n, 1), lambda i: (i, 0)),   # target tile
        ],
        out_specs=pl.BlockSpec((1, 8, 128), lambda i: (i, 0, 0)),
        compiler_params=pltpu.CompilerParams(
            dimension_semantics=("parallel",),             # megacore-shardable on v7x
            vmem_limit_bytes=32 * 1024 * 1024,
        ),
    )(logits, tgt)

    # tiny XLA-side combine of per-tile partials + ELBO scalar math
    ce_sum = jnp.sum(partials[:, 0, 0])
    ce_mean = ce_sum / jnp.float32(N)
    return (ce_mean * jnp.float32(train_size)
            + jnp.float32(beta) * jnp.asarray(kl, dtype=jnp.float32))


def elbo_reference(logits, target, kl, beta, train_size):
    # pure-JAX reference of PyTorch CrossEntropyLoss(mean) * train_size + beta*kl
    lg = logits.astype(jnp.float32)
    lse = jax.nn.logsumexp(lg, axis=-1)
    picked = jnp.take_along_axis(lg, target[:, None].astype(jnp.int32), axis=-1)[:, 0]
    ce = jnp.mean(lse - picked)
    return ce * train_size + beta * jnp.asarray(kl, dtype=jnp.float32)


if __name__ == "__main__":
    key = jax.random.PRNGKey(0)

    # --- case 1: original toy shape (single tile) -------------------------
    k1, k2, k3, key = jax.random.split(key, 4)
    N, C = 8, 32
    train_size, beta = 60000.0, 0.1
    logits = jax.random.normal(k1, (N, C), dtype=jnp.float32)
    target = jax.random.randint(k2, (N,), 0, C, dtype=jnp.int32)
    kl = jnp.abs(jax.random.normal(k3, (), dtype=jnp.float32)) * 10.0

    out = jax.block_until_ready(elbo_forward(logits, target, kl, beta, train_size))
    ref = elbo_reference(logits, target, kl, beta, train_size)
    assert jnp.allclose(out, ref, rtol=1e-5, atol=1e-3), (out, ref)

    # --- case 2: multi-tile grid with a masked partial last tile ----------
    k1, k2, k3, key = jax.random.split(key, 4)
    N2, C2 = 200, 16
    logits2 = jax.random.normal(k1, (N2, C2), dtype=jnp.float32)
    target2 = jax.random.randint(k2, (N2,), 0, C2, dtype=jnp.int32)
    kl2 = jnp.abs(jax.random.normal(k3, (), dtype=jnp.float32)) * 3.0

    out2 = jax.block_until_ready(
        elbo_forward(logits2, target2, kl2, 0.2, 1000.0, tile_n=64))  # 4 tiles, last padded
    ref2 = elbo_reference(logits2, target2, kl2, 0.2, 1000.0)
    assert jnp.allclose(out2, ref2, rtol=1e-5, atol=1e-2), (out2, ref2)

    # --- case 3: bf16 logits streamed natively, upcast in-kernel ----------
    k1, k2, k3, key = jax.random.split(key, 4)
    N3, C3 = 64, 40
    logits3 = jax.random.normal(k1, (N3, C3), dtype=jnp.float32).astype(jnp.bfloat16)
    target3 = jax.random.randint(k2, (N3,), 0, C3, dtype=jnp.int32)
    kl3 = jnp.abs(jax.random.normal(k3, (), dtype=jnp.float32)) * 2.0

    out3 = jax.block_until_ready(elbo_forward(logits3, target3, kl3, 0.05, 5000.0))
    ref3 = elbo_reference(logits3, target3, kl3, 0.05, 5000.0)
    assert jnp.allclose(out3, ref3, rtol=1e-4, atol=5e-2), (out3, ref3)

    print("KERNEL_OK")
</pallas_src>

<mosaic_0001>
module attributes {stable_mosaic.version = 11 : i64} {
  func.func @_ce_partial_kernel(%arg0: i32, %arg1: memref<8x32xf32, #tpu.memory_space<vmem>>, %arg2: memref<8x1xi32, #tpu.memory_space<vmem>>, %arg3: memref<1x8x128xf32, #tpu.memory_space<vmem>>) attributes {dimension_semantics = [#tpu.dimension_semantics<parallel>], iteration_bounds = array<i64: 1>, scalar_prefetch = 0 : i64, scratch_operands = 0 : i64, tpu.core_type = #tpu.core_type<tc>, window_params = [{transform_indices = @transform_0, window_bounds = array<i64: 8, 32>}, {transform_indices = @transform_1, window_bounds = array<i64: 8, 1>}, {transform_indices = @transform_2, window_bounds = array<i64: 1, 8, 128>}]} {
    %c0 = arith.constant 0 : index
    %c0_0 = arith.constant 0 : index
    %0 = vector.load %arg1[%c0, %c0_0] : memref<8x32xf32, #tpu.memory_space<vmem>>, vector<8x32xf32>
    %c0_1 = arith.constant 0 : index
    %c0_2 = arith.constant 0 : index
    %1 = vector.load %arg2[%c0_1, %c0_2] : memref<8x1xi32, #tpu.memory_space<vmem>>, vector<8x1xi32>
    %cst = arith.constant dense<0xFF800000> : vector<8xf32>
    %2 = vector.multi_reduction <maximumf>, %0, %cst [1] : vector<8x32xf32> to vector<8xf32>
    %3 = vector.shape_cast %2 : vector<8xf32> to vector<8x1xf32>
    %4 = vector.broadcast %3 : vector<8x1xf32> to vector<8x32xf32>
    %5 = arith.subf %0, %4 : vector<8x32xf32>
    %6 = math.exp %5 : vector<8x32xf32>
    %cst_3 = arith.constant dense<0.000000e+00> : vector<8xf32>
    %7 = vector.multi_reduction <add>, %6, %cst_3 [1] : vector<8x32xf32> to vector<8xf32>
    %8 = vector.shape_cast %7 : vector<8xf32> to vector<8x1xf32>
    %9 = math.log %8 : vector<8x1xf32>
    %10 = arith.addf %9, %3 : vector<8x1xf32>
    %11 = tpu.iota {dimensions = array<i32: 1>} : vector<8x32xi32>
    %12 = vector.broadcast %1 : vector<8x1xi32> to vector<8x32xi32>
    %13 = arith.cmpi eq, %11, %12 : vector<8x32xi32>
    %cst_4 = arith.constant 0.000000e+00 : f32
    %14 = vector.broadcast %cst_4 : f32 to vector<8x32xf32>
    %15 = arith.select %13, %0, %14 : vector<8x32xi1>, vector<8x32xf32>
    %cst_5 = arith.constant dense<0.000000e+00> : vector<8xf32>
    %16 = vector.multi_reduction <add>, %15, %cst_5 [1] : vector<8x32xf32> to vector<8xf32>
    %17 = vector.shape_cast %16 : vector<8xf32> to vector<8x1xf32>
    %18 = arith.subf %10, %17 : vector<8x1xf32>
    %19 = tpu.iota {dimensions = array<i32: 0>} : vector<8x1xi32>
    %c8_i32 = arith.constant 8 : i32
    %20 = arith.muli %arg0, %c8_i32 : i32
    %21 = vector.broadcast %20 : i32 to vector<8x1xi32>
    %22 = arith.addi %19, %21 : vector<8x1xi32>
    %c8_i32_6 = arith.constant 8 : i32
    %23 = vector.broadcast %c8_i32_6 : i32 to vector<8x1xi32>
    %24 = arith.cmpi slt, %22, %23 : vector<8x1xi32>
    %cst_7 = arith.constant 0.000000e+00 : f32
    %25 = vector.broadcast %cst_7 : f32 to vector<8x1xf32>
    %26 = arith.select %24, %18, %25 : vector<8x1xi1>, vector<8x1xf32>
    %27 = vector.shape_cast %26 : vector<8x1xf32> to vector<1x8x1xf32>
    %cst_8 = arith.constant dense<0.000000e+00> : vector<1xf32>
    %28 = vector.multi_reduction <add>, %27, %cst_8 [1, 2] : vector<1x8x1xf32> to vector<1xf32>
    %29 = vector.shape_cast %28 : vector<1xf32> to vector<1x1x1xf32>
    %30 = vector.extract %29[0, 0, 0] : f32 from vector<1x1x1xf32>
    %31 = vector.broadcast %30 : f32 to vector<1x8x128xf32>
    %c0_9 = arith.constant 0 : index
    %c0_10 = arith.constant 0 : index
    %c0_11 = arith.constant 0 : index
    %32 = vector.load %arg3[%c0_9, %c0_10, %c0_11] : memref<1x8x128xf32, #tpu.memory_space<vmem>>, vector<1x8x128xf32>
    tpu.vector_store %arg3[%c0_9, %c0_10, %c0_11], %31 {strides = array<i32>} : memref<1x8x128xf32, #tpu.memory_space<vmem>>, vector<1x8x128xf32>,
    return
  }
  func.func @transform_0(%arg0: i32) -> (i32, i32) {
    %c0_i32 = arith.constant 0 : i32
    %c0_i32_0 = arith.constant 0 : i32
    return %arg0, %c0_i32 : i32, i32
  }
  func.func @transform_1(%arg0: i32) -> (i32, i32) {
    %c0_i32 = arith.constant 0 : i32
    %c0_i32_0 = arith.constant 0 : i32
    return %arg0, %c0_i32 : i32, i32
  }
  func.func @transform_2(%arg0: i32) -> (i32, i32, i32) {
    %c0_i32 = arith.constant 0 : i32
    %c0_i32_0 = arith.constant 0 : i32
    %c0_i32_1 = arith.constant 0 : i32
    return %arg0, %c0_i32, %c0_i32_0 : i32, i32, i32
  }
}

</mosaic_0001>

<bundles_post_ra>
// kernel: tpu_custom_call.1
= control target key start
LH: loop header
LB: loop body
LE: loop exit
PB: predicated region body
PF: predicated region fallthrough
CT: control target
= control target key end

     0   :  { %vm14_vm0 = vcmask 261120   ;;  %s132_s0 = inlined_call_operand.vmem [shape: f32[8,32], index: 0, kind: input, shape index: {}]   ;;  %s133_s1 = inlined_call_operand.vmem [shape: s32[8,1], index: 1, kind: input, shape index: {}]   ;;  %s134_s2 = inlined_call_operand.hbm [shape: f32[1,8,128], index: 2, kind: output, shape index: {}]  }
   0x1   :  { %v12_v0 = vld [vmem:[%s132_s0] sm:$0xff] }
   0x2   :  { %7 = vsyncpa [#allocation3], 0  ;;  %v15_v1 = vsel %vm14_vm0, %v12_v0, -inf  ;;  %v103_v2 = vmov 0   ;;  %v13_v3 = vld [vmem:[%s133_s1] sm:$0xff]  ;;  %v27_v7 = vlaneseq  ;;  %vm45_vm2 = vcmask 7168  }
   0x3   :  { %76 = vset.pattern.permute.xlu0 %v103_v2  ;;  %s104_s0 = smov [#allocation2]  }
   0x4   :  { %16 = vmax.xlane.f32.xlu0 %v15_v1  ;;  %v28_v8 = vand.u32 127, %v27_v7  ;;  %s64_s1 = sshll.u32 %s104_s0, 4  ;;  %s65_s1 = int_to_ptr.vmem [resolvable:$true] %s64_s1 }
   0x5   :  { %s81_s14 = scalar_lea.vmem %s65_s1, 128  ;;  %p86_p1 = scmp.lt.s32.totalorder %s65_s1, %s65_s1 }
   0x6   :  { %p82_p0 = scmp.ne.s32.totalorder %s65_s1, %s81_s14  ;;  %p87_p2 = scmp.lt.s32.totalorder %s81_s14, %s81_s14 }
   0x8   :  { %p88_p3 = por %p87_p2, %p86_p1 }
   0xa   :  { %p89_p4 = pnand %p88_p3, %p82_p0 }
  0x1a   :  { %30 = vperm.xlu0 %76, %v13_v3  }
  0x8d   :  { %v17_v4 = vpop.xlane.xlu0 %16 }
  0x8e   :  { %v18_v5 = vsub.f32 %v12_v0, %v17_v4 }
  0x90   :  { %v19_v6 = vmul.f32 1.442695, %v18_v5 }
  0x92   :  { %77 = vpow2.f32 %v19_v6 }
  0x95   :  { %v31_v9 = vpop.permute.xlu0 %30 }
  0x96   :  { %vm32_vm1 = vcmp.eq.s32.totalorder %v28_v8, %v31_v9 }
  0x97   :  { %v33_v11 = vsel %vm32_vm1, %v12_v0, 0.0 }
  0x98   :  { %v34_v13 = vsel %vm14_vm0, %v33_v11, 0.0 }
  0x9f   :  { %v78_v10 = vpop.eup %77 }
  0xa0   :  { %v21_v12 = vsel %vm14_vm0, %v78_v10, 0.0 }
  0xa1   :  { %22 = vadd.xlane.f32.xlu1 %v21_v12 }
  0xa5   :  { %35 = vadd.xlane.f32.xlu1 %v34_v13 }
 0x12a   :  { %v23_v14 = vpop.xlane.xlu1 %22 }
 0x12b   :  { %79 = vlog2.f32 %v23_v14 }
 0x12e   :  { %v36_v17 = vpop.xlane.xlu1 %35 }
 0x138   :  { %v80_v15 = vpop.eup %79 }
 0x139   :  { %v25_v16 = vmul.f32 0.6931472, %v80_v15 }
 0x13b   :  { %v26_v18 = vadd.f32 %v25_v16, %v17_v4 }
 0x13d   :  { %v37_v19 = vsub.f32 %v26_v18, %v36_v17 }
 0x13f   :  { %v46_v20 = vsel %vm45_vm2, %v37_v19, 0.0 }
 0x140   :  { %47 = vadd.xlane.f32.xlu1 %v46_v20 }
 0x1c9   :  { %v48_v21 = vpop.xlane.xlu1 %47 }
 0x1ca   :  { %v49_v22 = vrot.slane %v48_v21, 4 }
 0x1cc   :  { %v50_v23 = vadd.f32 %v49_v22, %v48_v21 }
 0x1ce   :  { %v51_v24 = vrot.slane %v50_v23, 2 }
 0x1d0   :  { %v52_v25 = vadd.f32 %v51_v24, %v50_v23 }
 0x1d2   :  { %v53_v26 = vrot.slane %v52_v25, 1 }
 0x1d4   :  { %v54_v27 = vadd.f32 %v53_v26, %v52_v25 }
 0x1d6   :  { %72 = vpush %v54_v27 }
 0x207   :  { %s73_s13 = spop %72 }
 0x208   :  { %v56_v28 = vstv %s73_s13 }
 0x209   :  { %57 = vst [vmem:[#allocation2] sm:$0xff] %v56_v28 }
 0x20a   :  { %92 = shalt.err (!%p89_p4)
}
 0x20b   :  { %67 = dma.vmem_to_hbm [thread:$0]  %s65_s1, 128, %s134_s2, [#allocation3]  }
 0x20c   :  { %101 = dma.done.wait [#allocation3], 128  }
 0x20d   :  { %102 = vsyncadd [#allocation3], 4294967168 }
 0x20e   :  { %71 = vsyncpa [#allocation3], 1 }

</bundles_post_ra>
